<compile_context>
chip_gen: v7x
topology: tpu7x:2x2x1
jax: 0.10.0
libtpu: 0.0.40
codegen_flags: <defaults>
</compile_context>

<pallas_src>
import functools

import jax
import jax.numpy as jnp
import numpy as np
from jax import lax
from jax.experimental import pallas as pl
from jax.experimental.pallas import tpu as pltpu


def _round_up(x, m):
    return ((x + m - 1) // m) * m


def _pick_tile(n, cap=512):
    """Largest tile in {cap, 256, 128} that divides n (n is a multiple of 128)."""
    for t in (cap, 256, 128):
        if t <= n and n % t == 0:
            return t
    return n


# ----------------------------------------------------------------------------
# Kernel 1: one LightGCN propagation layer   out = A_norm @ E
#   grid = (Np // TM, Np // TK); A tiles (TM, TK) bf16, E tiles (TK, Dp) bf16,
#   f32 accumulator scratch resident across the K axis.
# ----------------------------------------------------------------------------
def _lgcn_layer_kernel(a_ref, e_ref, o_ref, acc_ref):
    k = pl.program_id(1)

    @pl.when(k == 0)
    def _init():
        acc_ref[...] = jnp.zeros_like(acc_ref)

    acc_ref[...] += jnp.dot(a_ref[...], e_ref[...],
                            preferred_element_type=jnp.float32)

    @pl.when(k == pl.num_programs(1) - 1)
    def _store():
        o_ref[...] = acc_ref[...]


def lgcn_layer_matmul(adj_bf16, e_bf16):
    n, _ = adj_bf16.shape
    _, d = e_bf16.shape
    tm = _pick_tile(n)
    tk = _pick_tile(n)
    grid = (n // tm, n // tk)
    return pl.pallas_call(
        _lgcn_layer_kernel,
        out_shape=jax.ShapeDtypeStruct((n, d), jnp.float32),
        grid_spec=pltpu.PrefetchScalarGridSpec(
            num_scalar_prefetch=0,
            grid=grid,
            in_specs=[
                pl.BlockSpec((tm, tk), lambda i, k: (i, k)),
                pl.BlockSpec((tk, d), lambda i, k: (k, 0)),
            ],
            out_specs=pl.BlockSpec((tm, d), lambda i, k: (i, 0)),
            scratch_shapes=[pltpu.VMEM((tm, d), jnp.float32)],
        ),
        compiler_params=pltpu.CompilerParams(
            dimension_semantics=("parallel", "arbitrary")),
    )(adj_bf16, e_bf16)


def lgcn_propagate(adj_bf16, ego_f32, n_layers):
    """mean_{k=0..L} A^k @ E, layer sum accumulated in f32."""
    e = ego_f32
    acc = ego_f32
    for _ in range(n_layers):
        e = lgcn_layer_matmul(adj_bf16, e.astype(jnp.bfloat16))
        acc = acc + e
    return acc * (1.0 / float(n_layers + 1))


# ----------------------------------------------------------------------------
# Kernel 2: fused predictor Linear + momentum target mix (users & items merged)
#   pred   = online @ W^T + b        (bf16 MXU inputs, f32 accumulation)
#   target = hist * m + online * (1 - m)   (f32 VPU)
# ----------------------------------------------------------------------------
def _pred_target_kernel(online_ref, hist_ref, w_ref, b_ref,
                        pred_ref, tgt_ref, *, momentum):
    online = online_ref[...]
    pred = lax.dot_general(
        online.astype(jnp.bfloat16), w_ref[...],
        dimension_numbers=(((1,), (1,)), ((), ())),  # contract on W's "in" axis
        preferred_element_type=jnp.float32)
    pred_ref[...] = pred + b_ref[...]
    tgt_ref[...] = hist_ref[...] * momentum + online * (1.0 - momentum)


def predictor_and_target(online, hist, w_bf16, b_row, momentum, tb=128):
    b, d = online.shape
    bp = _round_up(b, tb)
    pad = bp - b
    if pad:
        online = jnp.pad(online, ((0, pad), (0, 0)))
        hist = jnp.pad(hist, ((0, pad), (0, 0)))
    grid = (bp // tb,)
    pred, tgt = pl.pallas_call(
        functools.partial(_pred_target_kernel, momentum=float(momentum)),
        out_shape=(
            jax.ShapeDtypeStruct((bp, d), jnp.float32),
            jax.ShapeDtypeStruct((bp, d), jnp.float32),
        ),
        grid_spec=pltpu.PrefetchScalarGridSpec(
            num_scalar_prefetch=0,
            grid=grid,
            in_specs=[
                pl.BlockSpec((tb, d), lambda i: (i, 0)),
                pl.BlockSpec((tb, d), lambda i: (i, 0)),
                pl.BlockSpec((d, d), lambda i: (0, 0)),
                pl.BlockSpec((1, d), lambda i: (0, 0)),
            ],
            out_specs=(
                pl.BlockSpec((tb, d), lambda i: (i, 0)),
                pl.BlockSpec((tb, d), lambda i: (i, 0)),
            ),
        ),
        compiler_params=pltpu.CompilerParams(
            dimension_semantics=("parallel",)),
    )(online, hist, w_bf16, b_row)
    return pred[:b], tgt[:b]


# ----------------------------------------------------------------------------
# In-place (donated) history writeback: O(batch) HBM traffic instead of a
# full-table copy.
# ----------------------------------------------------------------------------
@functools.partial(jax.jit, donate_argnums=(0,))
def _scatter_rows(table, idx, rows):
    return table.at[idx].set(rows)


# ----------------------------------------------------------------------------
# Model wrapper mirroring SelfCF_HE semantics.
# ----------------------------------------------------------------------------
class SelfCFHEPallas:
    def __init__(self, key, user_num, item_num, emb_size, momentum, n_layers,
                 norm_adj):
        self.user_num = user_num
        self.item_num = item_num
        self.emb_size = emb_size
        self.momentum = momentum
        self.n_layers = n_layers

        n = user_num + item_num
        self.d_pad = _round_up(emb_size, 128)       # lane-dense embedding dim
        self.n_pad = _round_up(n, 128)              # aligned node count

        # padded, bf16 normalized adjacency (zero rows/cols do not affect real rows)
        adj = jnp.zeros((self.n_pad, self.n_pad), jnp.float32)
        adj = adj.at[:n, :n].set(norm_adj)
        self.norm_adj_bf16 = adj.astype(jnp.bfloat16)

        ks = jax.random.split(key, 6)
        # LGCN_Encoder embeddings
        self.user_emb = 0.1 * jax.random.normal(ks[0], (user_num, emb_size),
                                                jnp.float32)
        self.item_emb = 0.1 * jax.random.normal(ks[1], (item_num, emb_size),
                                                jnp.float32)
        # predictor = nn.Linear(emb_size, emb_size): W is (out, in)
        bound = 1.0 / np.sqrt(emb_size)
        self.pred_w = jax.random.uniform(ks[2], (emb_size, emb_size),
                                         jnp.float32, -bound, bound)
        self.pred_b = jax.random.uniform(ks[3], (emb_size,),
                                         jnp.float32, -bound, bound)
        # padded copies used by the kernel (bf16 weight, f32 bias row)
        w_pad = jnp.zeros((self.d_pad, self.d_pad), jnp.float32)
        w_pad = w_pad.at[:emb_size, :emb_size].set(self.pred_w)
        self.pred_w_bf16 = w_pad.astype(jnp.bfloat16)
        self.pred_b_row = jnp.zeros((1, self.d_pad), jnp.float32
                                    ).at[0, :emb_size].set(self.pred_b)

        # target histories (torch.randn in the reference), lane-padded
        u_his = jax.random.normal(ks[4], (user_num, emb_size), jnp.float32)
        i_his = jax.random.normal(ks[5], (item_num, emb_size), jnp.float32)
        self.u_target_his = jnp.zeros((user_num, self.d_pad), jnp.float32
                                      ).at[:, :emb_size].set(u_his)
        self.i_target_his = jnp.zeros((item_num, self.d_pad), jnp.float32
                                      ).at[:, :emb_size].set(i_his)

    def online_encoder(self):
        u, i, d = self.user_num, self.item_num, self.emb_size
        ego = jnp.zeros((self.n_pad, self.d_pad), jnp.float32)
        ego = ego.at[:u, :d].set(self.user_emb)
        ego = ego.at[u:u + i, :d].set(self.item_emb)
        all_emb = lgcn_propagate(self.norm_adj_bf16, ego, self.n_layers)
        return all_emb[:u], all_emb[u:u + i]      # lane-padded (., d_pad)

    def forward(self, users, items):
        u_all, i_all = self.online_encoder()

        # gather (glue, XLA)
        u_on = jnp.take(u_all, users, axis=0)
        i_on = jnp.take(i_all, items, axis=0)
        u_hist = jnp.take(self.u_target_his, users, axis=0)
        i_hist = jnp.take(self.i_target_his, items, axis=0)

        # single fused predictor + momentum-target call for users AND items
        b = users.shape[0]
        online = jnp.concatenate([u_on, i_on], axis=0)
        hist = jnp.concatenate([u_hist, i_hist], axis=0)
        pred, target = predictor_and_target(
            online, hist, self.pred_w_bf16, self.pred_b_row, self.momentum)

        d = self.emb_size
        u_pred, i_pred = pred[:b, :d], pred[b:2 * b, :d]
        u_target, i_target = target[:b, :d], target[b:2 * b, :d]

        # in-place history writeback (donated buffers)
        self.u_target_his = _scatter_rows(self.u_target_his, users, u_on)
        self.i_target_his = _scatter_rows(self.i_target_his, items, i_on)

        return u_pred, u_target, i_pred, i_target


def build_norm_adj(key, user_num, item_num):
    """Dense D^{-1/2} A D^{-1/2} LightGCN adjacency from random interactions."""
    n = user_num + item_num
    r = (jax.random.uniform(key, (user_num, item_num)) < 0.2).astype(jnp.float32)
    adj = jnp.zeros((n, n), jnp.float32)
    adj = adj.at[:user_num, user_num:].set(r)
    adj = adj.at[user_num:, :user_num].set(r.T)
    deg = jnp.sum(adj, axis=1)
    d_inv_sqrt = jnp.where(deg > 0, 1.0 / jnp.sqrt(jnp.maximum(deg, 1e-12)), 0.0)
    return adj * d_inv_sqrt[:, None] * d_inv_sqrt[None, :]


if __name__ == "__main__":
    key = jax.random.PRNGKey(0)
    k_adj, k_model, k_u, k_i = jax.random.split(key, 4)

    USER_NUM, ITEM_NUM, EMB, N_LAYERS, MOMENTUM, BATCH = 100, 180, 32, 2, 0.05, 8

    norm_adj = build_norm_adj(k_adj, USER_NUM, ITEM_NUM)
    model = SelfCFHEPallas(k_model, USER_NUM, ITEM_NUM, EMB, MOMENTUM,
                           N_LAYERS, norm_adj)

    users = jax.random.randint(k_u, (BATCH,), 0, USER_NUM)
    items = jax.random.randint(k_i, (BATCH,), 0, ITEM_NUM)

    # snapshot the pre-update history rows needed for the reference check
    # (separate buffers, so the donated in-place update cannot invalidate them)
    u_his0 = jnp.take(model.u_target_his, users, axis=0)[:, :EMB]
    i_his0 = jnp.take(model.i_target_his, items, axis=0)[:, :EMB]

    u_pred, u_target, i_pred, i_target = model.forward(users, items)
    jax.block_until_ready((u_pred, u_target, i_pred, i_target,
                           model.u_target_his, model.i_target_his))

    # ---- pure-JAX f32 reference (bf16 MXU inputs => loosened tolerance) ----
    ego = jnp.concatenate([model.user_emb, model.item_emb], axis=0)
    e, acc = ego, ego
    for _ in range(N_LAYERS):
        e = norm_adj @ e
        acc = acc + e
    all_ref = acc / (N_LAYERS + 1)
    u_all_ref, i_all_ref = all_ref[:USER_NUM], all_ref[USER_NUM:]
    u_on_ref, i_on_ref = u_all_ref[users], i_all_ref[items]
    u_pred_ref = u_on_ref @ model.pred_w.T + model.pred_b
    i_pred_ref = i_on_ref @ model.pred_w.T + model.pred_b
    u_tgt_ref = u_his0 * MOMENTUM + u_on_ref * (1.0 - MOMENTUM)
    i_tgt_ref = i_his0 * MOMENTUM + i_on_ref * (1.0 - MOMENTUM)

    TOL = dict(atol=2e-2, rtol=2e-2)
    assert np.allclose(u_pred, u_pred_ref, **TOL)
    assert np.allclose(i_pred, i_pred_ref, **TOL)
    assert np.allclose(u_target, u_tgt_ref, **TOL)
    assert np.allclose(i_target, i_tgt_ref, **TOL)
    # history writeback check
    assert np.allclose(np.asarray(model.u_target_his)[np.asarray(users), :EMB],
                       u_on_ref, **TOL)
    assert np.allclose(np.asarray(model.i_target_his)[np.asarray(items), :EMB],
                       i_on_ref, **TOL)

    print("KERNEL_OK")
</pallas_src>

<mosaic_0001>
module attributes {stable_mosaic.version = 11 : i64} {
  func.func @_lgcn_layer_kernel(%arg0: i32, %arg1: i32, %arg2: memref<128x128xbf16, #tpu.memory_space<vmem>>, %arg3: memref<128x128xbf16, #tpu.memory_space<vmem>>, %arg4: memref<128x128xf32, #tpu.memory_space<vmem>>, %arg5: memref<128x128xf32, #tpu.memory_space<vmem>>) attributes {dimension_semantics = [#tpu.dimension_semantics<parallel>, #tpu.dimension_semantics<arbitrary>], iteration_bounds = array<i64: 3, 3>, scalar_prefetch = 0 : i64, scratch_operands = 1 : i64, tpu.core_type = #tpu.core_type<tc>, window_params = [{transform_indices = @transform_0, window_bounds = array<i64: 128, 128>}, {transform_indices = @transform_1, window_bounds = array<i64: 128, 128>}, {transform_indices = @transform_2, window_bounds = array<i64: 128, 128>}]} {
    %c0_i32 = arith.constant 0 : i32
    %0 = arith.cmpi eq, %arg1, %c0_i32 : i32
    %1 = arith.extui %0 : i1 to i32
    %c0_i32_0 = arith.constant 0 : i32
    %2 = arith.cmpi ne, %1, %c0_i32_0 : i32
    scf.if %2 {
      %cst_9 = arith.constant 0.000000e+00 : f32
      %12 = vector.broadcast %cst_9 : f32 to vector<128x128xf32>
      %c0_10 = arith.constant 0 : index
      %c0_11 = arith.constant 0 : index
      %13 = vector.load %arg5[%c0_10, %c0_11] : memref<128x128xf32, #tpu.memory_space<vmem>>, vector<128x128xf32>
      tpu.vector_store %arg5[%c0_10, %c0_11], %12 {strides = array<i32>} : memref<128x128xf32, #tpu.memory_space<vmem>>, vector<128x128xf32>,
    } else {
    }
    %c0 = arith.constant 0 : index
    %c0_1 = arith.constant 0 : index
    %3 = vector.load %arg5[%c0, %c0_1] : memref<128x128xf32, #tpu.memory_space<vmem>>, vector<128x128xf32>
    %c0_2 = arith.constant 0 : index
    %c0_3 = arith.constant 0 : index
    %4 = vector.load %arg2[%c0_2, %c0_3] : memref<128x128xbf16, #tpu.memory_space<vmem>>, vector<128x128xbf16>
    %c0_4 = arith.constant 0 : index
    %c0_5 = arith.constant 0 : index
    %5 = vector.load %arg3[%c0_4, %c0_5] : memref<128x128xbf16, #tpu.memory_space<vmem>>, vector<128x128xbf16>
    %cst = arith.constant dense<0.000000e+00> : vector<128x128xf32>
    %6 = tpu.matmul %4, %5, %cst {dimension_numbers = #tpu.dot_dimension_numbers<[1], [0], [0], [1], [0, 0, 1, 1], [], []>} : vector<128x128xbf16>, vector<128x128xbf16>, vector<128x128xf32> -> vector<128x128xf32>
    %7 = arith.addf %3, %6 : vector<128x128xf32>
    %c0_6 = arith.constant 0 : index
    %c0_7 = arith.constant 0 : index
    %8 = vector.load %arg5[%c0_6, %c0_7] : memref<128x128xf32, #tpu.memory_space<vmem>>, vector<128x128xf32>
    tpu.vector_store %arg5[%c0_6, %c0_7], %7 {strides = array<i32>} : memref<128x128xf32, #tpu.memory_space<vmem>>, vector<128x128xf32>,
    %c2_i32 = arith.constant 2 : i32
    %9 = arith.cmpi eq, %arg1, %c2_i32 : i32
    %10 = arith.extui %9 : i1 to i32
    %c0_i32_8 = arith.constant 0 : i32
    %11 = arith.cmpi ne, %10, %c0_i32_8 : i32
    scf.if %11 {
      %c0_9 = arith.constant 0 : index
      %c0_10 = arith.constant 0 : index
      %12 = vector.load %arg5[%c0_9, %c0_10] : memref<128x128xf32, #tpu.memory_space<vmem>>, vector<128x128xf32>
      %c0_11 = arith.constant 0 : index
      %c0_12 = arith.constant 0 : index
      %13 = vector.load %arg4[%c0_11, %c0_12] : memref<128x128xf32, #tpu.memory_space<vmem>>, vector<128x128xf32>
      tpu.vector_store %arg4[%c0_11, %c0_12], %12 {strides = array<i32>} : memref<128x128xf32, #tpu.memory_space<vmem>>, vector<128x128xf32>,
    } else {
    }
    return
  }
  func.func @transform_0(%arg0: i32, %arg1: i32) -> (i32, i32) {
    %c0_i32 = arith.constant 0 : i32
    return %arg0, %arg1 : i32, i32
  }
  func.func @transform_1(%arg0: i32, %arg1: i32) -> (i32, i32) {
    %c0_i32 = arith.constant 0 : i32
    %c0_i32_0 = arith.constant 0 : i32
    return %arg1, %c0_i32 : i32, i32
  }
  func.func @transform_2(%arg0: i32, %arg1: i32) -> (i32, i32) {
    %c0_i32 = arith.constant 0 : i32
    %c0_i32_0 = arith.constant 0 : i32
    return %arg0, %c0_i32 : i32, i32
  }
}

</mosaic_0001>

<bundles_post_ra>
// kernel: tpu_custom_call.1
= control target key start
LH: loop header
LB: loop body
LE: loop exit
PB: predicated region body
PF: predicated region fallthrough
CT: control target
= control target key end

     0   :  { %s1554_s0 = inlined_call_operand.hbm [shape: bf16[384,384], index: 0, kind: input, shape index: {}]   ;;  %s1555_s1 = inlined_call_operand.hbm [shape: bf16[384,128], index: 1, kind: input, shape index: {}]   ;;  %s1556_s2 = inlined_call_operand.hbm [shape: f32[384,128], index: 2, kind: output, shape index: {}]  }
   0x1   :  { %1569 = sst [smem:[#allocation17_spill]] %s1554_s0 }
   0x2   :  { %1570 = sst [smem:[#allocation18_spill]] %s1556_s2 }
   0x3   :  { %7 = vsyncpa [#allocation4], 0 }
   0x4   :  { %9 = vsyncpa [#allocation4 + $0x1], 0 }
   0x5   :  { %10 = vsyncpa [#allocation7], 0 }
   0x6   :  { %12 = vsyncpa [#allocation7 + $0x1], 0 }
   0x7   :  { %13 = vsyncpa [#allocation5], 0 }
   0x8   :  { %15 = vsyncpa [#allocation5 + $0x1], 0  ;;  %s1168_s9 = smov 0   ;;  %s1170_s10 = smov 0  }
   0x9   :  { %s1172_s11 = smov 0   ;;  %s1174_s12 = smov 0  }
   0xa   :  { %s1176_s13 = smov 0   ;;  %s1178_s14 = smov 0  }
   0xb   :  { %s1180_s15 = smov 0   ;;  %s1182_s16 = smov 0  }
   0xc   :  { %s1184_s17 = smov 0   ;;  %s1186_s18 = smov 0  }
   0xd   :  { %s1188_s19 = smov 0   ;;  %s1190_s20 = smov 0  }
   0xe   :  { %s1192_s21 = smov 0   ;;  %s1194_s22 = smov 0  }
   0xf LB: > { %1571 = sst [smem:[#allocation12_spill]] %s1130_s19  ;;  %s30_s23 = sadd.s32 1, %s1134_s20  ;;  %s1142_s22 = sphi %s1194_s22, %s21_s22   ;;  %s1138_s21 = sphi %s1192_s21, %s1601_s21   ;;  %s1134_s20 = sphi %s1190_s20, %s1600_s20   ;;  %s1130_s19 = sphi %s1188_s19, %s1599_s19   ;;  %s1126_s18 = sphi %s1186_s18, %s1598_s18   ;;  %s1122_s17 = sphi %s1184_s17, %s1611_s17   ;;  %s1118_s16 = sphi %s1182_s16, %s1610_s16   ;;  %s1114_s15 = sphi %s1180_s15, %s1609_s15   ;;  %s1110_s14 = sphi %s1178_s14, %s1608_s14   ;;  %s1106_s13 = sphi %s1176_s13, %s1607_s13   ;;  %s1102_s12 = sphi %s1174_s12, %s1606_s12   ;;  %s1098_s11 = sphi %s1172_s11, %s1605_s11   ;;  %s1094_s10 = sphi %s1170_s10, %s1604_s10   ;;  %s1090_s9 = sphi %s1168_s9, %s1603_s9  }
  0x10   : > { %1572 = sst [smem:[#allocation13_spill]] %s1134_s20  ;;  %s33_s24 = sadd.s32 1, %s1138_s21 }
  0x11   : > { %1573 = sst [smem:[#allocation14_spill]] %s1138_s21  ;;  %p31_p0 = scmp.ge.s32.totalorder %s30_s23, 3 }
  0x12   : > { %s42_s25 = sadd.s32 1, %s1122_s17  ;;  %p49_p1 = scmp.ne.s32.totalorder %s1122_s17, %s1118_s16 }
  0x13   : > { %p1561_p2 = scmp.eq.s32.totalorder %s1142_s22, 0  ;;  %s1613_s23 = smov (%p31_p0, %s30_s23), 0 }
  0x14   : > { %1574 = sst [smem:[#allocation15_spill]] %s1613_s23  ;;  %s1615_s24 = smov (!%p31_p0, %s33_s24), %s1138_s21 }
  0x15   : > { %s1249_s26 = ssub.s32 %s1134_s20, %s1613_s23  ;;  %p1253_p3 = por %p1561_p2, %p49_p1 }
  0x16   : > { %p35_p4 = scmp.ge.s32.totalorder %s1615_s24, 3  ;;  %s94_s28 = sadd.s32 1, %s1098_s11 }
  0x17   : > { %p1560_p7 = scmp.lt.s32.totalorder %s1142_s22, 9  ;;  %s131_s30 = sand.u32 1, %s1122_s17  }
  0x18   : > { %s1617_s24 = smov (%p35_p4, %s1615_s24), 0  ;;  %s678_s6 = sshll.u32 %s131_s30, 6 }
  0x19   : > { %1576 = sst [smem:[#allocation16_spill]] %s1617_s24  ;;  %s37_s29 = ssub.s32 %s1138_s21, %s1617_s24 }
  0x1a   : > { %s39_s3 = sor.u32 %s1249_s26, %s37_s29  ;;  %p92_p8 = scmp.eq.s32.totalorder %s37_s29, 0 }
  0x1b   : > { %p40_p9 = scmp.eq.s32.totalorder %s39_s3, 0  ;;  %s778_s7 = smul.u32 48, %s1138_s21 }
  0x1c   : > { %s1269_s4 = scalar_select %p92_p8, %s1098_s11, %s94_s28  }
  0x1d   : > { %s1272_s5 = scalar_select %p40_p9, %s1122_s17, %s42_s25  }
  0x1e   : > { %p1279_p10 = pnand %p1560_p7, %p1253_p3  ;;  %s141_s24 = sadd.s32 %s1134_s20, %s778_s7 }
  0x1f   : > { %s135_s23 = scalar_lea.vmem [#allocation3], %s678_s6  ;;  %s681_s19 = sshll.u32 %s141_s24, 6 }
  0x20   : > { %s144_s2 = sshll.u32 %s135_s23, 4  ;;  %s1578_s0 = sld [smem:[#allocation17_spill]]  ;;  %s1284_s2 = int_to_ptr.vmem [resolvable:$true] %s144_s2 }
  0x21   : > { %p685_p11 = scmp.ge.s32.totalorder %s1142_s22, 1  ;;  %s1292_s27 = scalar_lea.sflag [#allocation4], %s131_s30 }
  0x22   : > { %p934_p13 = pneg %p1279_p10 }
  0x26   : > { %s1289_s25 = scalar_lea.hbm %s1578_s0, %s681_s19  ;;  %s937_s19 = scalar_lea.hbm %s1578_s0, 9216 }
  0x27   : > { %s932_s3 = scalar_lea.hbm %s1289_s25, 1024  ;;  %p938_p3 = scmp.lt.u32.totalorder %s1289_s25, %s1578_s0 }
  0x28   : > { %p933_p12 = scmp.ne.s32.totalorder %s1289_s25, %s932_s3  ;;  %p939_p4 = scmp.lt.u32.totalorder %s937_s19, %s932_s3 }
  0x29   : > { %p941_p9 = scmp.lt.u32.totalorder %s932_s3, %s1289_s25 }
  0x2a   : > { %p935_p0 = pnand %p934_p13, %p933_p12  ;;  %p940_p8 = por %p939_p4, %p938_p3 }
  0x2c   : > { %p936_p1 = pneg %p935_p0  ;;  %p942_p7 = por %p941_p9, %p940_p8 }
  0x2e   : > { %p943_p2 = pnand %p942_p7, %p936_p1 }
  0x30   : > { %946 = shalt.err (!%p943_p2)
}
  0x31   : > { %s947_s30 = scalar_lea.vmem %s1284_s2, 1024  ;;  %s1144_s28 = smov [#allocation3]  }
  0x32   : > { %p948_p12 = scmp.ne.s32.totalorder %s1284_s2, %s947_s30  ;;  %s952_s29 = sshll.u32 %s1144_s28, 4  ;;  %s953_s29 = int_to_ptr.vmem [resolvable:$false] %s952_s29 }
  0x33   : > { %s954_s23 = scalar_lea.vmem %s953_s29, 2048  ;;  %p955_p6 = scmp.lt.s32.totalorder %s1284_s2, %s953_s29 }
  0x34   : > { %p950_p0 = pnand %p948_p12, %p934_p13  ;;  %p956_p3 = scmp.lt.s32.totalorder %s954_s23, %s947_s30 }
  0x36   : > { %p951_p5 = pneg %p950_p0  ;;  %p957_p4 = por %p956_p3, %p955_p6 }
  0x38   : > { %p958_p8 = pnand %p957_p4, %p951_p5 }
  0x3a   : > { %961 = shalt.err (!%p958_p8)
}
  0x3b   : > { %s1145_s3 = smov 192   ;;  %s1562_s24 = smov 64  }
  0x3c   : > { %s1563_s19 = smov 4   ;;  %p173_p2 = scmp.lt.s32.totalorder %s1142_s22, 10 }
  0x3d   : > { %788 = dma.hbm_to_vmem [thread:$0]  (!%p1279_p10), %s1289_s25, 1024, %s1284_s2, %s1292_s27, %s1145_s3, %s1562_s24, %s1563_s19  }
  0x3e   : > { %p1325_p5 = pnand %p685_p11, %p173_p2  ;;  %s674_s7 = sadd.s32 4294967295, %s1142_s22  }
  0x3f   : > { %s675_s30 = sadd.s32 4294967294, %s1142_s22   ;;  %p56_p6 = scmp.eq.s32.totalorder %s674_s7, 0 }
  0x40   : > { %s68_s28 = sadd.s32 1, %s1110_s14  ;;  %p1580_p7 = scmp.eq.s32.totalorder %s1249_s26, 0 }
  0x41   : > { %p1581_p13 = scmp.ne.s32.totalorder %s1118_s16, %s1114_s15  ;;  %p75_p10 = scmp.ne.s32.totalorder %s1110_s14, %s1106_s13 }
  0x42   : > { %s1335_s29 = scalar_select %p1580_p7, %s1110_s14, %s68_s28  }
  0x43   : > { %p1340_p1 = por %p56_p6, %p1581_p13  ;;  %p81_p11 = scmp.ne.s32.totalorder %s1106_s13, %s1102_s12 }
  0x44   : > { %p104_p9 = scmp.ne.s32.totalorder %s1098_s11, %s1094_s10  ;;  %p1583_p12 = scmp.eq.s32.totalorder %s1142_s22, 0 }
  0x45   : > { %s1582_s8 = scalar_select %p1340_p1, 1, 0 }
  0x46   : > { %p77_p0 = por %p75_p10, %p1583_p12  ;;  %p105_p3 = scmp.eq.s32.totalorder %s674_s7, 8 }
  0x47   : > { %p1352_p4 = por %p81_p11, %p56_p6  ;;  %p110_p8 = scmp.ne.s32.totalorder %s1094_s10, %s1090_s9 }
  0x48   : > { %p1358_p2 = por %p105_p3, %p104_p9  ;;  %p111_p7 = scmp.eq.s32.totalorder %s675_s30, 8 }
  0x49   : > { %s1584_s2 = scalar_select %p1352_p4, 1, 0 }
  0x4a   : > { %s1585_s26 = scalar_select %p1358_p2, 1, 0 }
  0x4b   : > { %s154_s15 = sand.u32 1, %s1110_s14   ;;  %s712_s25 = sshll.u32 %s1134_s20, 10 }
  0x4c   : > { %p1364_p13 = por %p111_p7, %p110_p8  ;;  %s682_s12 = sshll.u32 %s154_s15, 6 }
  0x4d   : > { %s1371_s7 = scalar_lea.hbm %s1555_s1, %s712_s25  ;;  %p1587_p6 = scmp.lt.s32.totalorder %s1142_s22, 9 }
  0x4e   : > { %s1586_s27 = scalar_select %p1364_p13, 1, 0 }
  0x4f   : > { %p1375_p10 = pnand %p1587_p6, %p77_p0  ;;  %s158_s30 = scalar_lea.vmem [#allocation6], %s682_s12 }
  0x50   : > { %s165_s24 = sshll.u32 %s158_s30, 4  ;;  %s1381_s19 = scalar_lea.sflag [#allocation7], %s154_s15  ;;  %s1379_s24 = int_to_ptr.vmem [resolvable:$true] %s165_s24 }
  0x51   : > { %s962_s23 = scalar_lea.hbm %s1371_s7, 1024  ;;  %p964_p9 = pneg %p1375_p10 }
  0x52   : > { %p963_p11 = scmp.ne.s32.totalorder %s1371_s7, %s962_s23  ;;  %s967_s0 = scalar_lea.hbm %s1555_s1, 3072 }
  0x53   : > { %p968_p0 = scmp.lt.u32.totalorder %s1371_s7, %s1555_s1  ;;  %p969_p8 = scmp.lt.u32.totalorder %s967_s0, %s962_s23 }
  0x54   : > { %p965_p12 = pnand %p964_p9, %p963_p11  ;;  %p971_p6 = scmp.lt.u32.totalorder %s962_s23, %s1371_s7 }
  0x55   : > { %p970_p7 = por %p969_p8, %p968_p0 }
  0x56   : > { %p966_p3 = pneg %p965_p12 }
  0x57   : > { %p972_p13 = por %p971_p6, %p970_p7 }
  0x59   : > { %p973_p2 = pnand %p972_p13, %p966_p3 }
  0x5b   : > { %976 = shalt.err (!%p973_p2)
}
  0x5c   : > { %s977_s15 = scalar_lea.vmem %s1379_s24, 1024  ;;  %s1148_s12 = smov [#allocation6]  }
  0x5d   : > { %p978_p11 = scmp.ne.s32.totalorder %s1379_s24, %s977_s15  ;;  %s982_s30 = sshll.u32 %s1148_s12, 4  ;;  %s983_s30 = int_to_ptr.vmem [resolvable:$false] %s982_s30 }
  0x5e   : > { %s984_s20 = scalar_lea.vmem %s983_s30, 2048  ;;  %p985_p1 = scmp.lt.s32.totalorder %s1379_s24, %s983_s30 }
  0x5f   : > { %p980_p12 = pnand %p978_p11, %p964_p9  ;;  %p986_p0 = scmp.lt.s32.totalorder %s984_s20, %s977_s15 }
  0x61   : > { %p981_p4 = pneg %p980_p12  ;;  %p987_p8 = por %p986_p0, %p985_p1 }
  0x63   : > { %p988_p7 = pnand %p987_p8, %p981_p4 }
  0x65   : > { %991 = shalt.err (!%p988_p7)
}
  0x66   : > { %s1589_s0 = smov 4   ;;  %s1590_s21 = smov 64  }
  0x67   : > { %791 = dma.hbm_to_vmem [thread:$0]  (!%p1375_p10), %s1371_s7, 1024, %s1379_s24, %s1381_s19, %s1590_s21, %s1590_s21, %s1589_s0  }
  0x68   : > { %177 = sbr.rel (%p1325_p5) target bundleno = 422 (0x1a6), region = 28  ;;  %s179_s23 = sand.u32 (!%p1325_p5), 1, %s1118_s16  }
  0x69   : > { %s686_s25 = sshll.u32 (!%p1325_p5), %s179_s23, 6  ;;  %s180_s3 = scalar_lea.sflag (!%p1325_p5), [#allocation4], %s179_s23 }
  0x6a   : > { %s1415_s15 = scalar_lea.vmem (!%p1325_p5), [#allocation3], %s686_s25  ;;  %p1591_p1 = scmp.ne.s32.totalorder (!%p1325_p5), %s1582_s8, 0 }
  0x6f   : > { %1077 = dma.done.wait (%p1591_p1), %s180_s3, 1024  }
  0x70   : > { %1079 = vsyncadd (%p1591_p1), %s180_s3, 4294966272  ;;  %s188_s28 = sand.u32 1, %s1106_s13   ;;  %p1592_p5 = scmp.ne.s32.totalorder %s1584_s2, 0 }
  0x71   : > { %s687_s12 = sshll.u32 %s188_s28, 6  ;;  %s189_s24 = scalar_lea.sflag [#allocation7], %s188_s28 }
  0x72   : > { %s1422_s19 = scalar_lea.vmem [#allocation6], %s687_s12 }
  0x73   : > { %1081 = dma.done.wait (%p1592_p5), %s189_s24, 1024  }
  0x74   : > { %1083 = vsyncadd (%p1592_p5), %s189_s24, 4294966272  ;;  %s215_s6 = sand.u32 1, %s1094_s10   ;;  %p689_p4 = scmp.ne.s32.totalorder %s1126_s18, 0 }
  0x75   : > { %s688_s7 = sshll.u32 %s215_s6, 7  ;;  %v1149_v0 = vmov (!%p689_p4), 0.0  }
  0x76   : > { %s1431_s30 = scalar_lea.vmem [#allocation8], %s688_s7  ;;  %225 = sbr.rel (%p689_p4) target bundleno = 126 (0x7e), region = 40  ;;  %226 = vst [vmem:[#allocation2] sm:$0xff] (!%p689_p4), %v1149_v0  ;;  %227 = vst [vmem:[#allocation2 + $0x8] sm:$0xff] (!%p689_p4), %v1149_v0 }
  0x77   : > { %228 = vst [vmem:[#allocation2 + $0x10] sm:$0xff] (!%p689_p4), %v1149_v0  ;;  %229 = vst [vmem:[#allocation2 + $0x18] sm:$0xff] (!%p689_p4), %v1149_v0 }
  0x78   : > { %230 = vst [vmem:[#allocation2 + $0x20] sm:$0xff] (!%p689_p4), %v1149_v0  ;;  %231 = vst [vmem:[#allocation2 + $0x28] sm:$0xff] (!%p689_p4), %v1149_v0 }
  0x79   : > { %232 = vst [vmem:[#allocation2 + $0x30] sm:$0xff] (!%p689_p4), %v1149_v0  ;;  %233 = vst [vmem:[#allocation2 + $0x38] sm:$0xff] (!%p689_p4), %v1149_v0 }
  0x7a   : > { %234 = vst [vmem:[#allocation2 + $0x40] sm:$0xff] (!%p689_p4), %v1149_v0  ;;  %235 = vst [vmem:[#allocation2 + $0x48] sm:$0xff] (!%p689_p4), %v1149_v0 }
  0x7b   : > { %236 = vst [vmem:[#allocation2 + $0x50] sm:$0xff] (!%p689_p4), %v1149_v0  ;;  %237 = vst [vmem:[#allocation2 + $0x58] sm:$0xff] (!%p689_p4), %v1149_v0 }
  0x7c   : > { %238 = vst [vmem:[#allocation2 + $0x60] sm:$0xff] (!%p689_p4), %v1149_v0  ;;  %239 = vst [vmem:[#allocation2 + $0x68] sm:$0xff] (!%p689_p4), %v1149_v0 }
  0x7d   : > { %240 = vst [vmem:[#allocation2 + $0x70] sm:$0xff] %v1149_v0  ;;  %241 = vst [vmem:[#allocation2 + $0x78] sm:$0xff] %v1149_v0 }
  0x7e PF: > { %v916_v1 = vld [vmem:[%s1422_s19] sm:$0xff]   ;;  %v917_v2 = vld [vmem:[%s1422_s19 + $0x8] sm:$0xff]   ;;  %v918_v3 = vld [vmem:[%s1422_s19 + $0x10] sm:$0xff]   ;;  %p706_p2 = scmp.ne.s32.totalorder %s1126_s18, 2 }
  0x7f   : > { %730 = vmatprep.subr.bf16.mxu0 %v916_v1  ;;  %762 = vmatprep.subr.bf16.mxu1 %v916_v1  ;;  %v919_v4 = vld [vmem:[%s1422_s19 + $0x18] sm:$0xff]   ;;  %v924_v5 = vld [vmem:[%s1415_s15] sm:$0xff]   ;;  %v921_v8 = vld [vmem:[%s1422_s19 + $0x28] sm:$0xff]  }
  0x80   : > { %731 = vmatpush3.bf16.msra.mxu0 %v916_v1  ;;  %770 = vmatpush3.bf16.msra.mxu1 %v916_v1  ;;  %v925_v6 = vld [vmem:[%s1415_s15 + $0x20] sm:$0xff]   ;;  %v922_v9 = vld [vmem:[%s1422_s19 + $0x30] sm:$0xff]   ;;  %v923_v10 = vld [vmem:[%s1422_s19 + $0x38] sm:$0xff]  }
  0x81   : > { %732 = vmatprep.subr.bf16.mxu0 %v917_v2  ;;  %763 = vmatprep.subr.bf16.mxu1 %v917_v2  ;;  %v920_v7 = vld [vmem:[%s1422_s19 + $0x20] sm:$0xff]   ;;  %v926_v11 = vld [vmem:[%s1415_s15 + $0x8] sm:$0xff]   ;;  %v928_v13 = vld [vmem:[%s1415_s15 + $0x10] sm:$0xff]  }
  0x82   : > { %746 = vmatprep.mubr.bf16.mxu0 %v924_v5  ;;  %754 = vmatprep.mubr.bf16.mxu1 %v925_v6  ;;  %v927_v12 = vld [vmem:[%s1415_s15 + $0x28] sm:$0xff]   ;;  %v929_v14 = vld [vmem:[%s1415_s15 + $0x30] sm:$0xff]   ;;  %v930_v15 = vld [vmem:[%s1415_s15 + $0x18] sm:$0xff]  }
  0x83   : > { %v931_v16 = vld [vmem:[%s1415_s15 + $0x38] sm:$0xff]   ;;  %v244_v17 = vld [vmem:[#allocation2 + $0x10] sm:$0xff]  ;;  %v242_v19 = vld [vmem:[#allocation2] sm:$0xff] }
  0x84   : > { %733 = vmatpush3.bf16.msra.mxu0 %v917_v2  ;;  %771 = vmatpush3.bf16.msra.mxu1 %v917_v2  ;;  %v252_v18 = vld [vmem:[#allocation2 + $0x50] sm:$0xff]  ;;  %v250_v20 = vld [vmem:[#allocation2 + $0x40] sm:$0xff]  ;;  %v245_v23 = vld [vmem:[#allocation2 + $0x18] sm:$0xff] }
  0x85   : > { %734 = vmatprep.subr.bf16.mxu0 %v918_v3  ;;  %764 = vmatprep.subr.bf16.mxu1 %v918_v3  ;;  %v253_v24 = vld [vmem:[#allocation2 + $0x58] sm:$0xff]  ;;  %v243_v29 = vld [vmem:[#allocation2 + $0x8] sm:$0xff]  ;;  %v248_v41 = vld [vmem:[#allocation2 + $0x30] sm:$0xff] }
  0x86   : > { %v251_v30 = vld [vmem:[#allocation2 + $0x48] sm:$0xff]  ;;  %v256_v42 = vld [vmem:[#allocation2 + $0x70] sm:$0xff]  ;;  %v246_v43 = vld [vmem:[#allocation2 + $0x20] sm:$0xff] }
  0x87   : > { %v254_v44 = vld [vmem:[#allocation2 + $0x60] sm:$0xff]  ;;  %v249_v47 = vld [vmem:[#allocation2 + $0x38] sm:$0xff]  ;;  %v247_v53 = vld [vmem:[#allocation2 + $0x28] sm:$0xff] }
  0x88   : > { %735 = vmatpush3.bf16.msra.mxu0 %v918_v3  ;;  %772 = vmatpush3.bf16.msra.mxu1 %v918_v3  ;;  %v257_v48 = vld [vmem:[#allocation2 + $0x78] sm:$0xff]  ;;  %v255_v54 = vld [vmem:[#allocation2 + $0x68] sm:$0xff] }
  0x89   : > { %736 = vmatprep.subr.bf16.mxu0 %v919_v4  ;;  %765 = vmatprep.subr.bf16.mxu1 %v919_v4 }
  0x8c   : > { %737 = vmatpush3.bf16.msra.mxu0 %v919_v4  ;;  %773 = vmatpush3.bf16.msra.mxu1 %v919_v4 }
  0x8d   : > { %738 = vmatprep.subr.bf16.mxu0 %v920_v7  ;;  %766 = vmatprep.subr.bf16.mxu1 %v920_v7 }
  0x90   : > { %739 = vmatpush3.bf16.msra.mxu0 %v920_v7  ;;  %774 = vmatpush3.bf16.msra.mxu1 %v920_v7 }
  0x91   : > { %740 = vmatprep.subr.bf16.mxu0 %v921_v8  ;;  %767 = vmatprep.subr.bf16.mxu1 %v921_v8 }
  0x94   : > { %741 = vmatpush3.bf16.msra.mxu0 %v921_v8  ;;  %775 = vmatpush3.bf16.msra.mxu1 %v921_v8 }
  0x95   : > { %742 = vmatprep.subr.bf16.mxu0 %v922_v9  ;;  %768 = vmatprep.subr.bf16.mxu1 %v922_v9 }
  0x98   : > { %743 = vmatpush3.bf16.msra.mxu0 %v922_v9  ;;  %776 = vmatpush3.bf16.msra.mxu1 %v922_v9 }
  0x99   : > { %744 = vmatprep.subr.bf16.mxu0 %v923_v10  ;;  %769 = vmatprep.subr.bf16.mxu1 %v923_v10 }
  0x9c   : > { %745 = vmatpush3.bf16.msra.mxu0 %v923_v10  ;;  %777 = vmatpush3.bf16.msra.mxu1 %v923_v10 }
  0x9f   : > { %747 = vmatmul.mubr.bf16.vlgmr.msra.gmra.mrb[0].mxu0 %v926_v11  ;;  %755 = vmatmul.mubr.bf16.vlgmr.msra.gmra.mrb[0].mxu1 %v927_v12 }
  0xa0   : > { %750 = vmatprep.mubr.bf16.mxu0 %v928_v13  ;;  %758 = vmatprep.mubr.bf16.mxu1 %v929_v14 }
  0xa7   : > { %751 = vmatmul.mubr.bf16.gmra.mrb[4].mxu0 %v930_v15  ;;  %759 = vmatmul.mubr.bf16.gmra.mrb[4].mxu1 %v931_v16 }
 0x172   : > { %v748_v21 = vpop.f32.mrb[0].mxu0  ;;  %v756_v22 = vpop.f32.mrb[0].mxu1 }
 0x173   : > { %v485_v25 = vadd.f32 %v748_v21, %v244_v17  ;;  %v493_v26 = vadd.f32 %v756_v22, %v252_v18  ;;  %v420_v27 = vpop.f32.mrb[1].mxu0  ;;  %v452_v28 = vpop.f32.mrb[1].mxu1 }
 0x174   : > { %v483_v31 = vadd.f32 %v420_v27, %v242_v19  ;;  %v491_v32 = vadd.f32 %v452_v28, %v250_v20  ;;  %v749_v33 = vpop.f32.mrb[2].mxu0  ;;  %v757_v34 = vpop.f32.mrb[2].mxu1 }
 0x175   : > { %501 = vst [vmem:[#allocation2 + $0x10] sm:$0xff] %v485_v25  ;;  %509 = vst [vmem:[#allocation2 + $0x50] sm:$0xff] %v493_v26  ;;  %v486_v35 = vadd.f32 %v749_v33, %v245_v23  ;;  %v494_v36 = vadd.f32 %v757_v34, %v253_v24  ;;  %v423_v37 = vpop.f32.mrb[3].mxu0  ;;  %v455_v38 = vpop.f32.mrb[3].mxu1 }
 0x176   : > { %499 = vst [vmem:[#allocation2] sm:$0xff] %v483_v31  ;;  %507 = vst [vmem:[#allocation2 + $0x40] sm:$0xff] %v491_v32  ;;  %v484_v39 = vadd.f32 %v423_v37, %v243_v29  ;;  %v492_v40 = vadd.f32 %v455_v38, %v251_v30 }
 0x177   : > { %502 = vst [vmem:[#allocation2 + $0x18] sm:$0xff] %v486_v35  ;;  %510 = vst [vmem:[#allocation2 + $0x58] sm:$0xff] %v494_v36 }
 0x178   : > { %500 = vst [vmem:[#allocation2 + $0x8] sm:$0xff] %v484_v39  ;;  %508 = vst [vmem:[#allocation2 + $0x48] sm:$0xff] %v492_v40 }
 0x17a   : > { %v752_v45 = vpop.f32.mrb[4].mxu0  ;;  %v760_v46 = vpop.f32.mrb[4].mxu1  ;;  %518 = sbr.rel (%p706_p2) target bundleno = 394 (0x18a), region = 44 }
 0x17b   : > { %v489_v49 = vadd.f32 %v752_v45, %v248_v41  ;;  %v497_v50 = vadd.f32 %v760_v46, %v256_v42  ;;  %v436_v51 = vpop.f32.mrb[5].mxu0  ;;  %v468_v52 = vpop.f32.mrb[5].mxu1 }
 0x17c   : > { %v487_v55 = vadd.f32 %v436_v51, %v246_v43  ;;  %v495_v56 = vadd.f32 %v468_v52, %v254_v44  ;;  %v753_v57 = vpop.f32.mrb[6].mxu0  ;;  %v761_v58 = vpop.f32.mrb[6].mxu1  ;;  %v521_v3 = vld [vmem:[#allocation2 + $0x10] sm:$0xff] (!%p706_p2) }
 0x17d   : > { %505 = vst [vmem:[#allocation2 + $0x30] sm:$0xff] %v489_v49  ;;  %513 = vst [vmem:[#allocation2 + $0x70] sm:$0xff] %v497_v50  ;;  %v490_v59 = vadd.f32 %v753_v57, %v249_v47  ;;  %v498_v60 = vadd.f32 %v761_v58, %v257_v48  ;;  %v439_v61 = vpop.f32.mrb[7].mxu0  ;;  %v471_v62 = vpop.f32.mrb[7].mxu1  ;;  %v519_v1 = vld [vmem:[#allocation2] sm:$0xff] (!%p706_p2)  ;;  %v529_v11 = vld [vmem:[#allocation2 + $0x50] sm:$0xff] (!%p706_p2) }
 0x17e   : > { %503 = vst [vmem:[#allocation2 + $0x20] sm:$0xff] %v487_v55  ;;  %511 = vst [vmem:[#allocation2 + $0x60] sm:$0xff] %v495_v56  ;;  %v488_v63 = vadd.f32 %v439_v61, %v247_v53  ;;  %v496_v0 = vadd.f32 %v471_v62, %v255_v54  ;;  %v522_v4 = vld [vmem:[#allocation2 + $0x18] sm:$0xff] (!%p706_p2)  ;;  %v527_v9 = vld [vmem:[#allocation2 + $0x40] sm:$0xff] (!%p706_p2) }
 0x17f   : > { %506 = vst [vmem:[#allocation2 + $0x38] sm:$0xff] %v490_v59  ;;  %514 = vst [vmem:[#allocation2 + $0x78] sm:$0xff] %v498_v60  ;;  %v520_v2 = vld [vmem:[#allocation2 + $0x8] sm:$0xff] (!%p706_p2)  ;;  %v530_v12 = vld [vmem:[#allocation2 + $0x58] sm:$0xff] (!%p706_p2) }
 0x180   : > { %504 = vst [vmem:[#allocation2 + $0x28] sm:$0xff] %v488_v63  ;;  %512 = vst [vmem:[#allocation2 + $0x68] sm:$0xff] %v496_v0  ;;  %v528_v10 = vld [vmem:[#allocation2 + $0x48] sm:$0xff] (!%p706_p2) }
 0x181   : > { %535 = vst [vmem:[%s1431_s30] sm:$0xff] %v519_v1  ;;  %536 = vst [vmem:[%s1431_s30 + $0x8] sm:$0xff] %v520_v2 }
 0x182   : > { %537 = vst [vmem:[%s1431_s30 + $0x10] sm:$0xff] %v521_v3  ;;  %538 = vst [vmem:[%s1431_s30 + $0x18] sm:$0xff] %v522_v4 }
 0x183   : > { %543 = vst [vmem:[%s1431_s30 + $0x40] sm:$0xff] %v527_v9  ;;  %544 = vst [vmem:[%s1431_s30 + $0x48] sm:$0xff] %v528_v10 }
 0x184   : > { %v525_v7 = vld [vmem:[#allocation2 + $0x30] sm:$0xff]  ;;  %545 = vst [vmem:[%s1431_s30 + $0x50] sm:$0xff] %v529_v11  ;;  %546 = vst [vmem:[%s1431_s30 + $0x58] sm:$0xff] %v530_v12 }
 0x185   : > { %v523_v5 = vld [vmem:[#allocation2 + $0x20] sm:$0xff]  ;;  %541 = vst [vmem:[%s1431_s30 + $0x30] sm:$0xff] %v525_v7  ;;  %v533_v15 = vld [vmem:[#allocation2 + $0x70] sm:$0xff] }
 0x186   : > { %539 = vst [vmem:[%s1431_s30 + $0x20] sm:$0xff] %v523_v5  ;;  %v526_v8 = vld [vmem:[#allocation2 + $0x38] sm:$0xff]  ;;  %v531_v13 = vld [vmem:[#allocation2 + $0x60] sm:$0xff]  ;;  %549 = vst [vmem:[%s1431_s30 + $0x70] sm:$0xff] %v533_v15 }
 0x187   : > { %v524_v6 = vld [vmem:[#allocation2 + $0x28] sm:$0xff]  ;;  %542 = vst [vmem:[%s1431_s30 + $0x38] sm:$0xff] %v526_v8  ;;  %547 = vst [vmem:[%s1431_s30 + $0x60] sm:$0xff] %v531_v13  ;;  %v534_v16 = vld [vmem:[#allocation2 + $0x78] sm:$0xff] }
 0x188   : > { %540 = vst [vmem:[%s1431_s30 + $0x28] sm:$0xff] %v524_v6  ;;  %v532_v14 = vld [vmem:[#allocation2 + $0x68] sm:$0xff]  ;;  %550 = vst [vmem:[%s1431_s30 + $0x78] sm:$0xff] %v534_v16 }
 0x189   : > { %548 = vst [vmem:[%s1431_s30 + $0x68] sm:$0xff] %v532_v14 }
 0x18a PF: > { %s1593_s18 = sld [smem:[#allocation12_spill]]  ;;  %s1594_s0 = sld [smem:[#allocation18_spill]] }
 0x18b   : > { %s565_s23 = sshll.u32 %s1431_s30, 4  ;;  %s1478_s25 = scalar_lea.sflag [#allocation5], %s215_s6  ;;  %s1474_s23 = int_to_ptr.vmem [resolvable:$true] %s565_s23 }
 0x18c   : > { %s992_s3 = scalar_lea.vmem %s1474_s23, 2048  ;;  %p1595_p10 = scmp.ne.s32.totalorder %s1585_s26, 0 }
 0x18d   : > { %p993_p13 = scmp.ne.s32.totalorder %s1474_s23, %s992_s3  ;;  %s1150_s15 = smov [#allocation8]  }
 0x18e   : > { %s996_s28 = sshll.u32 %s1150_s15, 4  ;;  %s997_s28 = int_to_ptr.vmem [resolvable:$false] %s996_s28 }
 0x18f   : > { %p994_p9 = pnand %p993_p13, %p1595_p10  ;;  %s998_s12 = scalar_lea.vmem %s997_s28, 4096 }
 0x190   : > { %s713_s8 = sshll.u32 %s1593_s18, 11  ;;  %p999_p6 = scmp.lt.s32.totalorder %s1474_s23, %s997_s28 }
 0x191   : > { %s1471_s21 = scalar_lea.hbm %s1594_s0, %s713_s8  ;;  %p995_p3 = pneg %p994_p9 }
 0x192   : > { %p1000_p11 = scmp.lt.s32.totalorder %s998_s12, %s992_s3 }
 0x194   : > { %p1001_p12 = por %p1000_p11, %p999_p6 }
 0x196   : > { %p1002_p0 = pnand %p1001_p12, %p995_p3 }
 0x198   : > { %1005 = shalt.err (!%p1002_p0)
}
 0x199   : > { %s1006_s24 = scalar_lea.hbm %s1471_s21, 2048  ;;  %s1010_s7 = scalar_lea.hbm %s1594_s0, 6144 }
 0x19a   : > { %p1007_p8 = scmp.ne.s32.totalorder %s1471_s21, %s1006_s24  ;;  %p1011_p5 = scmp.lt.u32.totalorder %s1471_s21, %s1594_s0 }
 0x19b   : > { %p1012_p4 = scmp.lt.u32.totalorder %s1010_s7, %s1006_s24  ;;  %p1014_p13 = scmp.lt.u32.totalorder %s1006_s24, %s1471_s21 }
 0x19c   : > { %p1008_p7 = pnand %p1007_p8, %p1595_p10 }
 0x19d   : > { %p1013_p2 = por %p1012_p4, %p1011_p5 }
 0x19e   : > { %p1009_p1 = pneg %p1008_p7 }
 0x19f   : > { %p1015_p9 = por %p1014_p13, %p1013_p2 }
 0x1a1   : > { %p1016_p3 = pnand %p1015_p9, %p1009_p1 }
 0x1a3   : > { %1019 = shalt.err (!%p1016_p3)
}
 0x1a4   : > { %s1151_s8 = smov 128   ;;  %s1152_s2 = smov 8  }
 0x1a5   : > { %783 = dma.vmem_to_hbm [thread:$0]  (%p1595_p10), %s1474_s23, 2048, %s1471_s21, %s1478_s25, %s1151_s8, %s1151_s8, %s1152_s2  }
 0x1a6 PF: > { %p797_p6 = scmp.ge.s32.totalorder %s1142_s22, 2  ;;  %s580_s20 = sand.u32 1, %s1090_s9  }
 0x1a7   : > { %p1596_p11 = scmp.ne.s32.totalorder %s1586_s27, 0  ;;  %s581_s3 = scalar_lea.sflag [#allocation5], %s580_s20 }
 0x1a9   : > { %p793_p12 = pnand %p797_p6, %p1596_p11 }
 0x1ab   : > { %1085 = dma.done.wait (!%p793_p12), %s581_s3, 2048  }
 0x1ac   : > { %1087 = vsyncadd (!%p793_p12), %s581_s3, 4294965248  ;;  %s21_s22 = sadd.s32 1, %s1142_s22   ;;  %s1598_s18 = sld [smem:[#allocation13_spill]] }
 0x1ad   : > { %p1507_p0 = scmp.ge.s32.totalorder %s21_s22, 11   ;;  %s1599_s19 = sld [smem:[#allocation14_spill]] }
 0x1ae   : > { %s1600_s20 = sld [smem:[#allocation15_spill]]  ;;  %s1601_s21 = sld [smem:[#allocation16_spill]] }
 0x1af   : > { %s1603_s9 = smov %s1094_s10  ;;  %s1604_s10 = smov %s1098_s11 }
 0x1b0   : > { %s1605_s11 = smov %s1269_s4  ;;  %s1606_s12 = smov %s1106_s13 }
 0x1b1   : > { %s1607_s13 = smov %s1110_s14  ;;  %s1608_s14 = smov %s1335_s29 }
 0x1b2   : > { %s1609_s15 = smov %s1118_s16  ;;  %s1610_s16 = smov %s1122_s17 }
 0x1b3   : > { %s1611_s17 = smov %s1272_s5  ;;  %20 = sbr.rel (!%p1507_p0) target bundleno = 15 (0xf), region = 94 }
 0x1ba   :  { %586 = vsyncpa [#allocation4], 1 }
 0x1bb   :  { %588 = vsyncpa [#allocation4 + $0x1], 1 }
 0x1bc   :  { %589 = vsyncpa [#allocation7], 1 }
 0x1bd   :  { %591 = vsyncpa [#allocation7 + $0x1], 1 }
 0x1be   :  { %592 = vsyncpa [#allocation5], 1 }
 0x1bf   :  { %594 = vsyncpa [#allocation5 + $0x1], 1 }

</bundles_post_ra>
